<compile_context>
chip_gen: v5e
topology: v5e:2x2
jax: 0.10.0
libtpu: 0.0.40
codegen_flags: <defaults>
</compile_context>

<pallas_src>
import jax
import jax.numpy as jnp
from jax import lax
from jax.experimental import pallas as pl
from jax.experimental.pallas import tpu as pltpu

LOGIT_SCALE = 1000.0
COS_EPS = 1e-8      # F.cosine_similarity denominator clamp


def _cosine_logistic_kernel(wb_ref, a_ref, b_ref, y_ref, logits_ref, per_ref):
    """One grid step processes one independent (tile_n, D) slab of rows."""
    a = a_ref[...].astype(jnp.float32)          # (tile_n, D)
    b = b_ref[...].astype(jnp.float32)          # (tile_n, D)
    y = y_ref[...]                              # (tile_n, 1) f32

    # --- per-row cosine similarity (squared-norm / rsqrt form) -------------
    dot = jnp.sum(a * b, axis=-1, keepdims=True)        # (tile_n, 1)
    na2 = jnp.sum(a * a, axis=-1, keepdims=True)
    nb2 = jnp.sum(b * b, axis=-1, keepdims=True)
    # max(||a||*||b||, eps) == sqrt(max(||a||^2*||b||^2, eps^2))
    dist = dot * lax.rsqrt(jnp.maximum(na2 * nb2, COS_EPS * COS_EPS))

    # --- Linear(1,1); logit_scale folded into (w, b) by the wrapper --------
    w = wb_ref[0]
    bias = wb_ref[1]
    logits = w * dist + bias                             # (tile_n, 1)
    logits_ref[...] = logits

    # --- per-row BCEWithLogits terms (stable softplus form) ----------------
    per_ref[...] = (jnp.maximum(logits, 0.0) - logits * y
                    + jnp.log1p(jnp.exp(-jnp.abs(logits))))


def _pick_tile_n(n, d, itemsize, input_buffer_bytes=16 * 1024 * 1024):
    """Rows per tile: 2 inputs x 2 pipeline buffers of (tile_n, d) <= budget."""
    rows = max(1, input_buffer_bytes // (4 * d * itemsize))
    rows = max(128, min((rows // 128) * 128, 2048))
    if n <= rows:
        # Single tile: just round the batch up to a sublane multiple.
        return max(8, ((n + 7) // 8) * 8)
    return rows


@jax.jit
def _cosine_logistic_loss_impl(rep_a, rep_b, labels, weight, bias, logit_scale):
    n, d = rep_a.shape
    itemsize = jnp.dtype(rep_a.dtype).itemsize
    tile_n = _pick_tile_n(n, d, itemsize)
    num_tiles = pl.cdiv(n, tile_n)
    n_pad = num_tiles * tile_n

    def pad_rows(x):
        return x if n_pad == n else jnp.pad(x, ((0, n_pad - n), (0, 0)))

    a = pad_rows(rep_a)
    b = pad_rows(rep_b)
    y = pad_rows(labels.reshape(n, 1).astype(jnp.float32))

    # logit_scale folded into the Linear(1,1) parameters.
    wb_smem = jnp.array([logit_scale * weight, logit_scale * bias],
                        dtype=jnp.float32)

    # VMEM in flight: 2 embedding inputs x 2 pipeline buffers (+ tiny (tile_n,1)
    # tiles); 8 MiB headroom covers lane-padding for D < 128 and compiler temps.
    in_buf_bytes = 4 * tile_n * d * itemsize
    vmem_limit = int(min(in_buf_bytes + (8 << 20), 64 << 20))

    logits_pad, per_pad = pl.pallas_call(
        _cosine_logistic_kernel,
        out_shape=(jax.ShapeDtypeStruct((n_pad, 1), jnp.float32),
                   jax.ShapeDtypeStruct((n_pad, 1), jnp.float32)),
        grid=(num_tiles,),
        in_specs=[
            pl.BlockSpec(memory_space=pltpu.MemorySpace.SMEM),   # [w*s, b*s]
            pl.BlockSpec((tile_n, d), lambda i: (i, 0)),         # rep_a tile
            pl.BlockSpec((tile_n, d), lambda i: (i, 0)),         # rep_b tile
            pl.BlockSpec((tile_n, 1), lambda i: (i, 0)),         # labels tile
        ],
        out_specs=(
            pl.BlockSpec((tile_n, 1), lambda i: (i, 0)),         # logits
            pl.BlockSpec((tile_n, 1), lambda i: (i, 0)),         # per-row BCE
        ),
        compiler_params=pltpu.CompilerParams(
            dimension_semantics=("parallel",),                   # megacore on v7x
            vmem_limit_bytes=vmem_limit),
    )(wb_smem, a, b, y)

    logits = logits_pad[:n, 0]
    loss = jnp.sum(per_pad[:n, 0]) / jnp.float32(n)              # mean reduction
    return logits, loss


def cosine_logistic_loss(rep_a, rep_b, labels, weight=0.001, bias=0.0,
                         logit_scale=LOGIT_SCALE):
    """Returns (logits[N], loss) matching forward(..., return_both=True)."""
    return _cosine_logistic_loss_impl(rep_a, rep_b, labels,
                                      weight, bias, logit_scale)


if __name__ == "__main__":
    key = jax.random.PRNGKey(0)
    k_a, k_b, k_y = jax.random.split(key, 3)

    N, D = 8, 32                                   # batch=8, hidden=32
    # bf16 ingestion halves HBM traffic for this memory-bound kernel;
    # the kernel upcasts per tile and does all math in f32.
    rep_a = jax.random.normal(k_a, (N, D), dtype=jnp.float32).astype(jnp.bfloat16)
    rep_b = jax.random.normal(k_b, (N, D), dtype=jnp.float32).astype(jnp.bfloat16)
    labels = (jax.random.uniform(k_y, (N,)) > 0.5).astype(jnp.float32)

    # nn.init.constant_(classifier.weight, 0.001); nn.init.zeros_(classifier.bias)
    weight, bias = 0.001, 0.0

    logits, loss = cosine_logistic_loss(rep_a, rep_b, labels, weight, bias)
    jax.block_until_ready((logits, loss))

    # Pure-JAX reference (same bf16-quantized inputs, f32 math).
    a32 = rep_a.astype(jnp.float32)
    b32 = rep_b.astype(jnp.float32)
    cos = jnp.sum(a32 * b32, -1) / jnp.maximum(
        jnp.linalg.norm(a32, axis=-1) * jnp.linalg.norm(b32, axis=-1), COS_EPS)
    ref_logits = LOGIT_SCALE * (weight * cos + bias)
    ref_loss = jnp.mean(jnp.maximum(ref_logits, 0) - ref_logits * labels
                        + jnp.log1p(jnp.exp(-jnp.abs(ref_logits))))
    assert jnp.allclose(logits, ref_logits, atol=1e-3, rtol=1e-3)
    assert jnp.allclose(loss, ref_loss, atol=1e-3, rtol=1e-3)

    print("KERNEL_OK")
</pallas_src>

<mosaic_0001>
module attributes {stable_mosaic.version = 11 : i64} {
  func.func @_cosine_logistic_kernel(%arg0: i32, %arg1: memref<2xf32, #tpu.memory_space<smem>>, %arg2: memref<8x32xbf16, #tpu.memory_space<vmem>>, %arg3: memref<8x32xbf16, #tpu.memory_space<vmem>>, %arg4: memref<8x1xf32, #tpu.memory_space<vmem>>, %arg5: memref<8x1xf32, #tpu.memory_space<vmem>>, %arg6: memref<8x1xf32, #tpu.memory_space<vmem>>) attributes {dimension_semantics = [#tpu.dimension_semantics<parallel>], iteration_bounds = array<i64: 1>, scalar_prefetch = 0 : i64, scratch_operands = 0 : i64, tpu.core_type = #tpu.core_type<tc>, window_params = [{transform_indices = @transform_0, window_bounds = array<i64: 2>}, {transform_indices = @transform_1, window_bounds = array<i64: 8, 32>}, {transform_indices = @transform_2, window_bounds = array<i64: 8, 32>}, {transform_indices = @transform_3, window_bounds = array<i64: 8, 1>}, {transform_indices = @transform_4, window_bounds = array<i64: 8, 1>}, {transform_indices = @transform_5, window_bounds = array<i64: 8, 1>}]} {
    %c0 = arith.constant 0 : index
    %c0_0 = arith.constant 0 : index
    %0 = vector.load %arg2[%c0, %c0_0] : memref<8x32xbf16, #tpu.memory_space<vmem>>, vector<8x32xbf16>
    %1 = arith.extf %0 : vector<8x32xbf16> to vector<8x32xf32>
    %c0_1 = arith.constant 0 : index
    %c0_2 = arith.constant 0 : index
    %2 = vector.load %arg3[%c0_1, %c0_2] : memref<8x32xbf16, #tpu.memory_space<vmem>>, vector<8x32xbf16>
    %3 = arith.extf %2 : vector<8x32xbf16> to vector<8x32xf32>
    %c0_3 = arith.constant 0 : index
    %c0_4 = arith.constant 0 : index
    %4 = vector.load %arg4[%c0_3, %c0_4] : memref<8x1xf32, #tpu.memory_space<vmem>>, vector<8x1xf32>
    %5 = arith.mulf %1, %3 : vector<8x32xf32>
    %cst = arith.constant dense<0.000000e+00> : vector<8xf32>
    %6 = vector.multi_reduction <add>, %5, %cst [1] : vector<8x32xf32> to vector<8xf32>
    %7 = vector.shape_cast %6 : vector<8xf32> to vector<8x1xf32>
    %8 = arith.mulf %1, %1 : vector<8x32xf32>
    %cst_5 = arith.constant dense<0.000000e+00> : vector<8xf32>
    %9 = vector.multi_reduction <add>, %8, %cst_5 [1] : vector<8x32xf32> to vector<8xf32>
    %10 = vector.shape_cast %9 : vector<8xf32> to vector<8x1xf32>
    %11 = arith.mulf %3, %3 : vector<8x32xf32>
    %cst_6 = arith.constant dense<0.000000e+00> : vector<8xf32>
    %12 = vector.multi_reduction <add>, %11, %cst_6 [1] : vector<8x32xf32> to vector<8xf32>
    %13 = vector.shape_cast %12 : vector<8xf32> to vector<8x1xf32>
    %14 = arith.mulf %10, %13 : vector<8x1xf32>
    %cst_7 = arith.constant 1.000000e-16 : f32
    %15 = vector.broadcast %cst_7 : f32 to vector<8x1xf32>
    %16 = arith.maximumf %14, %15 : vector<8x1xf32>
    %17 = math.rsqrt %16 : vector<8x1xf32>
    %18 = arith.mulf %7, %17 : vector<8x1xf32>
    %c0_8 = arith.constant 0 : index
    %19 = memref.load %arg1[%c0_8] : memref<2xf32, #tpu.memory_space<smem>>
    %c1 = arith.constant 1 : index
    %20 = memref.load %arg1[%c1] : memref<2xf32, #tpu.memory_space<smem>>
    %21 = vector.broadcast %19 : f32 to vector<8x1xf32>
    %22 = arith.mulf %21, %18 : vector<8x1xf32>
    %23 = vector.broadcast %20 : f32 to vector<8x1xf32>
    %24 = arith.addf %22, %23 : vector<8x1xf32>
    %c0_9 = arith.constant 0 : index
    %c0_10 = arith.constant 0 : index
    %25 = vector.load %arg5[%c0_9, %c0_10] : memref<8x1xf32, #tpu.memory_space<vmem>>, vector<8x1xf32>
    tpu.vector_store %arg5[%c0_9, %c0_10], %24 {strides = array<i32>} : memref<8x1xf32, #tpu.memory_space<vmem>>, vector<8x1xf32>,
    %cst_11 = arith.constant 0.000000e+00 : f32
    %26 = vector.broadcast %cst_11 : f32 to vector<8x1xf32>
    %27 = arith.maximumf %24, %26 : vector<8x1xf32>
    %28 = arith.mulf %24, %4 : vector<8x1xf32>
    %29 = arith.subf %27, %28 : vector<8x1xf32>
    %30 = math.absf %24 : vector<8x1xf32>
    %cst_12 = arith.constant 0.000000e+00 : f32
    %31 = vector.broadcast %cst_12 : f32 to vector<8x1xf32>
    %32 = arith.subf %31, %30 : vector<8x1xf32>
    %33 = math.exp %32 : vector<8x1xf32>
    %34 = math.log1p %33 : vector<8x1xf32>
    %35 = arith.addf %29, %34 : vector<8x1xf32>
    %c0_13 = arith.constant 0 : index
    %c0_14 = arith.constant 0 : index
    %36 = vector.load %arg6[%c0_13, %c0_14] : memref<8x1xf32, #tpu.memory_space<vmem>>, vector<8x1xf32>
    tpu.vector_store %arg6[%c0_13, %c0_14], %35 {strides = array<i32>} : memref<8x1xf32, #tpu.memory_space<vmem>>, vector<8x1xf32>,
    return
  }
  func.func @transform_0(%arg0: i32) -> i32 {
    %c0_i32 = arith.constant 0 : i32
    %c0_i32_0 = arith.constant 0 : i32
    return %c0_i32 : i32
  }
  func.func @transform_1(%arg0: i32) -> (i32, i32) {
    %c0_i32 = arith.constant 0 : i32
    %c0_i32_0 = arith.constant 0 : i32
    return %arg0, %c0_i32 : i32, i32
  }
  func.func @transform_2(%arg0: i32) -> (i32, i32) {
    %c0_i32 = arith.constant 0 : i32
    %c0_i32_0 = arith.constant 0 : i32
    return %arg0, %c0_i32 : i32, i32
  }
  func.func @transform_3(%arg0: i32) -> (i32, i32) {
    %c0_i32 = arith.constant 0 : i32
    %c0_i32_0 = arith.constant 0 : i32
    return %arg0, %c0_i32 : i32, i32
  }
  func.func @transform_4(%arg0: i32) -> (i32, i32) {
    %c0_i32 = arith.constant 0 : i32
    %c0_i32_0 = arith.constant 0 : i32
    return %arg0, %c0_i32 : i32, i32
  }
  func.func @transform_5(%arg0: i32) -> (i32, i32) {
    %c0_i32 = arith.constant 0 : i32
    %c0_i32_0 = arith.constant 0 : i32
    return %arg0, %c0_i32 : i32, i32
  }
}

</mosaic_0001>

<bundles_post_ra>
// kernel: _cosine_logistic_loss_impl.1
= control target key start
LH: loop header
LB: loop body
LE: loop exit
PB: predicated region body
PF: predicated region fallthrough
CT: control target
= control target key end

     0   :  { %11 = vsyncpa [#allocation3], 0  ;;  %s120_s21 = smov [#allocation2]   ;;  %s171_s0 = inlined_call_operand.vmem [shape: f32[2], index: 0, kind: input, shape index: {}]   ;;  %s172_s1 = inlined_call_operand.vmem [shape: bf16[8,32], index: 1, kind: input, shape index: {}]   ;;  %s173_s2 = inlined_call_operand.vmem [shape: bf16[8,32], index: 2, kind: input, shape index: {}]   ;;  %s174_s3 = inlined_call_operand.vmem [shape: f32[8,1], index: 3, kind: input, shape index: {}]   ;;  %s175_s4 = inlined_call_operand.vmem [shape: f32[8,1], index: 4, kind: output, shape index: {0}]   ;;  %s176_s5 = inlined_call_operand.vmem [shape: f32[8,1], index: 5, kind: output, shape index: {1}]  }
   0x1   :  { %s17_s20 = sshll.u32 %s171_s0, 4  ;;  %s18_s20 = int_to_ptr.vmem [resolvable:$true] %s17_s20 }
   0x2   :  { %20 = dma.vmem_to_smem %s18_s20, 16, %s120_s21, [#allocation3]  }
   0x3   :  { %118 = dma.done.wait [#allocation3], 16  }
   0x4   :  { %119 = vsyncadd [#allocation3], 4294967280 }
   0x5   :  { %31 = sfence }
   0x6   :  { %v32_v0 = vld [vmem:[%s172_s1] sm:$0xf]  ;;  %vm38_vm0 = vcmask 261120   ;;  %s63_s0 = sld [smem:[#allocation2]]  ;;  %vm69_vm4 = vcmask 7168  }
   0x7   :  { %v34_v1 = vld [vmem:[%s173_s2] sm:$0xf]  ;;  %v33_v2 = vunpack.c.l.bf16 %v32_v0  ;;  %s98_s1 = sld [smem:[#allocation2 + $0x1]] }
   0x8   :  { %v35_v3 = vunpack.c.l.bf16 %v34_v1  ;;  %v36_v33 = vld [vmem:[%s174_s3] sm:$0xff] }
   0x9   :  { %v42_v4 = vmul.f32 %v33_v2, %v33_v2 }
   0xa   :  { %v37_v5 = vmul.f32 %v35_v3, %v33_v2  ;;  %v46_v8 = vmul.f32 %v35_v3, %v35_v3 }
   0xb   :  { %v43_v6 = vsel %vm38_vm0, %v42_v4, 0.0 }
   0xc   :  { %v39_v7 = vsel %vm38_vm0, %v37_v5, 0.0  ;;  %44 = vadd.xlane.f32.xlu0 %v43_v6  ;;  %v47_v9 = vsel %vm38_vm0, %v46_v8, 0.0  ;;  %v65_v22 = vstv %s63_s0 }
   0xd   :  { %40 = vadd.xlane.f32.xlu1 %v39_v7  ;;  %v67_v24 = vstv %s98_s1 }
  0x14   :  { %48 = vadd.xlane.f32.xlu0 %v47_v9 }
  0x7f   :  { %v45_v10 = vpop.xlane.xlu0 %44 }
  0x80   :  { %v41_v20 = vpop.xlane.xlu1 %40 }
  0x87   :  { %v49_v11 = vpop.xlane.xlu0 %48 }
  0x88   :  { %v50_v12 = vmul.f32 %v49_v11, %v45_v10 }
  0x8a   :  { %v51_v13 = vmax.f32 %v50_v12, 1e-16 }
  0x8c   :  { %100 = vrsqrt.f32 %v51_v13  ;;  %vm58_vm2 = vweird.f32 %v51_v13 }
  0x92   :  { %v101_v14 = vpop.eup %100 }
  0x93   :  { %v53_v15 = vmul.f32 %v101_v14, %v51_v13  ;;  %vm59_vm1 = vweird.f32 %v101_v14 }
  0x94   :  { %vm60_vm3 = vmor %vm58_vm2, %vm59_vm1 }
  0x95   :  { %v54_v16 = vmul.f32 %v101_v14, %v53_v15 }
  0x97   :  { %v55_v17 = vmul.f32 0.5, %v54_v16 }
  0x99   :  { %v56_v18 = vsub.f32 1.5, %v55_v17 }
  0x9b   :  { %v57_v19 = vmul.f32 %v101_v14, %v56_v18 }
  0x9d   :  { %v61_v21 = vsel %vm60_vm3, %v101_v14, %v57_v19 }
  0x9e   :  { %v62_v23 = vmul.f32 %v61_v21, %v41_v20 }
  0xa0   :  { %v66_v25 = vmul.f32 %v65_v22, %v62_v23 }
  0xa2   :  { %v68_v26 = vadd.f32 %v67_v24, %v66_v25 }
  0xa4   :  { %70 = vst.msk [vmem:[%s175_s4] sm:$0xff] %vm69_vm4, %v68_v26  ;;  %v74_v27 = vand.u32 2147483647, %v68_v26  ;;  %v71_v35 = vmax.f32 %v68_v26, 0.0  ;;  %v72_v36 = vmul.f32 %v68_v26, %v36_v33 }
  0xa6   :  { %v75_v28 = vsub.f32 0.0, %v74_v27  ;;  %v73_v41 = vsub.f32 %v71_v35, %v72_v36 }
  0xa8   :  { %v76_v29 = vmul.f32 1.442695, %v75_v28 }
  0xaa   :  { %102 = vpow2.f32 %v76_v29 }
  0xb0   :  { %v103_v30 = vpop.eup %102 }
  0xb1   :  { %v78_v31 = vadd.f32 1.0, %v103_v30  ;;  %v81_v32 = vmul.f32 -0.5, %v103_v30  ;;  %v84_v37 = vand.u32 2147483647, %v103_v30 }
  0xb3   :  { %104 = vlog2.f32 %v78_v31  ;;  %v82_v34 = vadd.f32 1.0, %v81_v32  ;;  %vm85_vm5 = vcmp.lt.f32.partialorder %v84_v37, 0.0004427343 }
  0xb5   :  { %v83_v40 = vmul.f32 %v103_v30, %v82_v34 }
  0xb9   :  { %v105_v38 = vpop.eup %104 }
  0xba   :  { %v80_v39 = vmul.f32 0.6931472, %v105_v38 }
  0xbc   :  { %v86_v42 = vsel %vm85_vm5, %v83_v40, %v80_v39 }
  0xbd   :  { %v87_v43 = vadd.f32 %v86_v42, %v73_v41 }
  0xbf   :  { %88 = vst.msk [vmem:[%s176_s5] sm:$0xff] %vm69_vm4, %v87_v43 }
  0xc0   :  { %97 = vsyncpa [#allocation3], 1 }

</bundles_post_ra>
